<compile_context>
chip_gen: v5e
topology: v5e:2x2
jax: 0.10.0
libtpu: 0.0.40
codegen_flags: <defaults>
</compile_context>

<pallas_src>
import functools

import jax
import jax.numpy as jnp
from jax import lax
from jax.experimental import pallas as pl
from jax.experimental.pallas import tpu as pltpu


def _inclusive_scan_lanes(x):
    """Inclusive prefix-sum along the last (lane) axis: log2(N) shifted adds."""
    n = x.shape[-1]
    shift = 1
    while shift < n:
        zeros = jnp.zeros(x.shape[:-1] + (shift,), x.dtype)
        x = x + jnp.concatenate([zeros, x[..., : n - shift]], axis=-1)
        shift *= 2
    return x


def _query_and_group_kernel(new_xyz_ref, new_xyz_t_ref, xyz_t_ref, feat_ref,
                            out_xyz_ref, out_feat_ref, *, radius, nsample):
    # new_xyz_ref:   (1, TP, 3)  query centers, point-major (for distances)
    # new_xyz_t_ref: (1, 3, TP)  query centers, coord-major (for subtraction)
    # xyz_t_ref:     (1, 3, N)   point coords, coord-major (gather source)
    # feat_ref:      (1, C, N)   features, channel-major (gather source)
    # out_xyz_ref:   (1, S, 3, TP)
    # out_feat_ref:  (1, S, C, TP)
    new_xyz = new_xyz_ref[0]        # (TP, 3)
    new_xyz_t = new_xyz_t_ref[0]    # (3, TP)
    xyz_t = xyz_t_ref[0]            # (3, N)
    feat = feat_ref[0]              # (C, N)

    TP = new_xyz.shape[0]
    N = xyz_t.shape[1]
    r2 = radius * radius

    # ---- squared distances (TP, N): per-coordinate VPU accumulation ----
    d2 = None
    for d in range(3):
        diff = new_xyz[:, d:d + 1] - xyz_t[d:d + 1, :]      # (TP,1)-(1,N) -> (TP,N)
        sq = diff * diff
        d2 = sq if d2 is None else d2 + sq

    mask = (d2 < r2).astype(jnp.float32)                    # strict <, like CUDA

    # ---- inclusive running match-count along N (cheap scan, no (N,N) matmul) ----
    cum = _inclusive_scan_lanes(mask)                       # (TP, N), exact ints in f32
    cnt = cum[:, N - 1:N]                                   # (TP, 1) total matches

    first_sel = mask * (cum == 1.0).astype(jnp.float32)     # one-hot of first match
    zero_sel = (lax.broadcasted_iota(jnp.int32, (TP, N), 1) == 0).astype(jnp.float32)
    fallback = jnp.where(cnt > 0.0, first_sel, zero_sel)    # (TP, N)

    dn = (((1,), (1,)), ((), ()))   # contract the N axis of both operands (A @ B^T)

    # ---- stream slot-by-slot: one-hot -> two MXU gathers -> lane-dense store ----
    @pl.loop(0, nsample)
    def _(s):
        s_f = s.astype(jnp.float32)
        sel_s = mask * (cum == s_f + 1.0).astype(jnp.float32)     # (s+1)-th match
        onehot = jnp.where(cnt > s_f, sel_s, fallback)            # (TP, N)
        g_xyz = lax.dot_general(xyz_t, onehot, dn,
                                preferred_element_type=jnp.float32)   # (3, TP)
        g_feat = lax.dot_general(feat, onehot, dn,
                                 preferred_element_type=jnp.float32)  # (C, TP)
        out_xyz_ref[0, pl.ds(s, 1), :, :] = (
            (g_xyz - new_xyz_t)[None].astype(out_xyz_ref.dtype))
        out_feat_ref[0, pl.ds(s, 1), :, :] = g_feat[None].astype(out_feat_ref.dtype)


def query_and_group(xyz, new_xyz, features=None, *, radius, nsample, use_xyz=True):
    """Pallas QueryAndGroup forward.

    xyz:      (B, N, 3) float32
    new_xyz:  (B, npoint, 3) float32
    features: (B, C, N) float32 or None
    returns:  (B, 3 + C, npoint, nsample)  (or (B, 3, npoint, nsample) /
              (B, C, npoint, nsample) depending on features / use_xyz)
    """
    B, N, _ = xyz.shape
    P = new_xyz.shape[1]
    S = int(nsample)

    if features is None:
        assert use_xyz, "Cannot have no features and not use xyz as a feature!"
        feats = jnp.zeros((B, 1, N), xyz.dtype)   # dummy channel, dropped below
    else:
        feats = features
    C = feats.shape[1]

    # P tile: keep the P tile as the lane (last) dim of every block.  Cap at 256
    # so per-step (TP, N) intermediates fit v7x's smaller VMEM.
    if P % 256 == 0:
        TP = 256
    elif P % 128 == 0:
        TP = 128
    else:
        TP = P
    n_pt = P // TP

    # glue: tiny layout prep only (no (B, N, 3+C) src array is built any more)
    xyz_t = jnp.transpose(xyz, (0, 2, 1))            # (B, 3, N)
    new_xyz_t = jnp.transpose(new_xyz, (0, 2, 1))    # (B, 3, P)

    kernel = functools.partial(_query_and_group_kernel,
                               radius=float(radius), nsample=S)

    out_xyz, out_feat = pl.pallas_call(
        kernel,
        out_shape=(jax.ShapeDtypeStruct((B, S, 3, P), jnp.float32),
                   jax.ShapeDtypeStruct((B, S, C, P), jnp.float32)),
        grid_spec=pltpu.PrefetchScalarGridSpec(
            num_scalar_prefetch=0,
            grid=(B, n_pt),
            in_specs=[
                pl.BlockSpec((1, TP, 3), lambda b, p: (b, p, 0)),   # new_xyz
                pl.BlockSpec((1, 3, TP), lambda b, p: (b, 0, p)),   # new_xyz^T
                pl.BlockSpec((1, 3, N), lambda b, p: (b, 0, 0)),    # xyz^T (resident over P)
                pl.BlockSpec((1, C, N), lambda b, p: (b, 0, 0)),    # features (resident over P)
            ],
            out_specs=[
                pl.BlockSpec((1, S, 3, TP), lambda b, p: (b, 0, 0, p)),
                pl.BlockSpec((1, S, C, TP), lambda b, p: (b, 0, 0, p)),
            ],
        ),
        compiler_params=pltpu.CompilerParams(
            dimension_semantics=("parallel", "parallel"),
            vmem_limit_bytes=48 * 1024 * 1024,
        ),
    )(new_xyz, new_xyz_t, xyz_t, feats)

    # glue: back to PyTorch layout (B, *, npoint, nsample)
    grouped_xyz = jnp.transpose(out_xyz, (0, 2, 3, 1))       # (B, 3, P, S)
    if features is None:
        return grouped_xyz
    grouped_feat = jnp.transpose(out_feat, (0, 2, 3, 1))     # (B, C, P, S)
    if use_xyz:
        return jnp.concatenate([grouped_xyz, grouped_feat], axis=1)
    return grouped_feat
    # TODO(synk): backward (group_points_grad) is not implemented; forward only.


def _reference(xyz, new_xyz, features, *, radius, nsample):
    """Pure-JAX reference with the exact CUDA ball-query fill semantics."""
    B, N, _ = xyz.shape
    d2 = jnp.sum((new_xyz[:, :, None, :] - xyz[:, None, :, :]) ** 2, axis=-1)
    mask = d2 < radius ** 2
    cum = jnp.cumsum(mask.astype(jnp.int32), axis=-1)
    count = cum[..., -1]
    n_iota = jnp.arange(N, dtype=jnp.int32)
    first_idx = jnp.sum(jnp.where(mask & (cum == 1), n_iota, 0), axis=-1)
    slots = []
    for s in range(nsample):
        k_idx = jnp.sum(jnp.where(mask & (cum == s + 1), n_iota, 0), axis=-1)
        slots.append(jnp.where(count > s, k_idx,
                               jnp.where(count > 0, first_idx, 0)))
    idx = jnp.stack(slots, axis=-1)                                  # (B, P, S)
    grouped_xyz = jax.vmap(lambda x, i: x[i])(xyz, idx)              # (B, P, S, 3)
    grouped_xyz = grouped_xyz - new_xyz[:, :, None, :]
    grouped_feat = jax.vmap(lambda f, i: f[:, i])(features, idx)     # (B, C, P, S)
    return jnp.concatenate(
        [jnp.transpose(grouped_xyz, (0, 3, 1, 2)), grouped_feat], axis=1)


if __name__ == "__main__":
    B, N, P, S, C = 2, 64, 16, 8, 4
    radius = 0.25

    key = jax.random.PRNGKey(0)
    k1, k2, k3 = jax.random.split(key, 3)
    xyz = jax.random.uniform(k1, (B, N, 3), dtype=jnp.float32)
    new_xyz = jax.random.uniform(k2, (B, P, 3), dtype=jnp.float32)
    features = jax.random.normal(k3, (B, C, N), dtype=jnp.float32)

    out = query_and_group(xyz, new_xyz, features, radius=radius, nsample=S)
    out = jax.block_until_ready(out)

    ref = _reference(xyz, new_xyz, features, radius=radius, nsample=S)
    assert out.shape == (B, 3 + C, P, S), out.shape
    max_err = float(jnp.max(jnp.abs(out - ref)))
    if max_err > 1e-4:
        raise AssertionError(f"mismatch vs reference: max_err={max_err}")

    print("KERNEL_OK")
</pallas_src>

<mosaic_0001>
module attributes {stable_mosaic.version = 11 : i64} {
  func.func @_query_and_group_kernel(%arg0: i32, %arg1: i32, %arg2: memref<1x16x3xf32, #tpu.memory_space<vmem>>, %arg3: memref<1x3x16xf32, #tpu.memory_space<vmem>>, %arg4: memref<1x3x64xf32, #tpu.memory_space<vmem>>, %arg5: memref<1x4x64xf32, #tpu.memory_space<vmem>>, %arg6: memref<1x8x3x16xf32, #tpu.memory_space<vmem>>, %arg7: memref<1x8x4x16xf32, #tpu.memory_space<vmem>>) attributes {dimension_semantics = [#tpu.dimension_semantics<parallel>, #tpu.dimension_semantics<parallel>], iteration_bounds = array<i64: 2, 1>, scalar_prefetch = 0 : i64, scratch_operands = 0 : i64, tpu.core_type = #tpu.core_type<tc>, window_params = [{transform_indices = @transform_0, window_bounds = array<i64: 1, 16, 3>}, {transform_indices = @transform_1, window_bounds = array<i64: 1, 3, 16>}, {transform_indices = @transform_2, window_bounds = array<i64: 1, 3, 64>}, {transform_indices = @transform_3, window_bounds = array<i64: 1, 4, 64>}, {transform_indices = @transform_4, window_bounds = array<i64: 1, 8, 3, 16>}, {transform_indices = @transform_5, window_bounds = array<i64: 1, 8, 4, 16>}]} {
    %c0 = arith.constant 0 : index
    %c0_0 = arith.constant 0 : index
    %c0_1 = arith.constant 0 : index
    %0 = vector.load %arg2[%c0, %c0_0, %c0_1] : memref<1x16x3xf32, #tpu.memory_space<vmem>>, vector<1x16x3xf32>
    %1 = vector.shape_cast %0 : vector<1x16x3xf32> to vector<16x3xf32>
    %c0_2 = arith.constant 0 : index
    %c0_3 = arith.constant 0 : index
    %c0_4 = arith.constant 0 : index
    %2 = vector.load %arg3[%c0_2, %c0_3, %c0_4] : memref<1x3x16xf32, #tpu.memory_space<vmem>>, vector<1x3x16xf32>
    %3 = vector.shape_cast %2 : vector<1x3x16xf32> to vector<3x16xf32>
    %c0_5 = arith.constant 0 : index
    %c0_6 = arith.constant 0 : index
    %c0_7 = arith.constant 0 : index
    %4 = vector.load %arg4[%c0_5, %c0_6, %c0_7] : memref<1x3x64xf32, #tpu.memory_space<vmem>>, vector<1x3x64xf32>
    %5 = vector.shape_cast %4 : vector<1x3x64xf32> to vector<3x64xf32>
    %c0_8 = arith.constant 0 : index
    %c0_9 = arith.constant 0 : index
    %c0_10 = arith.constant 0 : index
    %6 = vector.load %arg5[%c0_8, %c0_9, %c0_10] : memref<1x4x64xf32, #tpu.memory_space<vmem>>, vector<1x4x64xf32>
    %7 = vector.shape_cast %6 : vector<1x4x64xf32> to vector<4x64xf32>
    %8 = vector.extract_strided_slice %1 {offsets = [0, 0], sizes = [16, 1], strides = [1, 1]} : vector<16x3xf32> to vector<16x1xf32>
    %9 = vector.extract_strided_slice %5 {offsets = [0, 0], sizes = [1, 64], strides = [1, 1]} : vector<3x64xf32> to vector<1x64xf32>
    %10 = vector.broadcast %8 : vector<16x1xf32> to vector<16x64xf32>
    %11 = vector.broadcast %9 : vector<1x64xf32> to vector<16x64xf32>
    %12 = arith.subf %10, %11 : vector<16x64xf32>
    %13 = arith.mulf %12, %12 : vector<16x64xf32>
    %14 = vector.extract_strided_slice %1 {offsets = [0, 1], sizes = [16, 1], strides = [1, 1]} : vector<16x3xf32> to vector<16x1xf32>
    %15 = vector.extract_strided_slice %5 {offsets = [1, 0], sizes = [1, 64], strides = [1, 1]} : vector<3x64xf32> to vector<1x64xf32>
    %16 = vector.broadcast %14 : vector<16x1xf32> to vector<16x64xf32>
    %17 = vector.broadcast %15 : vector<1x64xf32> to vector<16x64xf32>
    %18 = arith.subf %16, %17 : vector<16x64xf32>
    %19 = arith.mulf %18, %18 : vector<16x64xf32>
    %20 = arith.addf %13, %19 : vector<16x64xf32>
    %21 = vector.extract_strided_slice %1 {offsets = [0, 2], sizes = [16, 1], strides = [1, 1]} : vector<16x3xf32> to vector<16x1xf32>
    %22 = vector.extract_strided_slice %5 {offsets = [2, 0], sizes = [1, 64], strides = [1, 1]} : vector<3x64xf32> to vector<1x64xf32>
    %23 = vector.broadcast %21 : vector<16x1xf32> to vector<16x64xf32>
    %24 = vector.broadcast %22 : vector<1x64xf32> to vector<16x64xf32>
    %25 = arith.subf %23, %24 : vector<16x64xf32>
    %26 = arith.mulf %25, %25 : vector<16x64xf32>
    %27 = arith.addf %20, %26 : vector<16x64xf32>
    %cst = arith.constant 6.250000e-02 : f32
    %28 = vector.broadcast %cst : f32 to vector<16x64xf32>
    %29 = arith.cmpf olt, %27, %28 : vector<16x64xf32>
    %30 = arith.extui %29 : vector<16x64xi1> to vector<16x64xi32>
    %31 = arith.sitofp %30 : vector<16x64xi32> to vector<16x64xf32>
    %cst_11 = arith.constant 0.000000e+00 : f32
    %32 = vector.broadcast %cst_11 : f32 to vector<16x1xf32>
    %33 = vector.extract_strided_slice %31 {offsets = [0, 0], sizes = [16, 63], strides = [1, 1]} : vector<16x64xf32> to vector<16x63xf32>
    %34 = tpu.concatenate %32, %33 in 1 : vector<16x1xf32>, vector<16x63xf32> -> vector<16x64xf32>
    %35 = arith.addf %31, %34 : vector<16x64xf32>
    %cst_12 = arith.constant 0.000000e+00 : f32
    %36 = vector.broadcast %cst_12 : f32 to vector<16x2xf32>
    %37 = vector.extract_strided_slice %35 {offsets = [0, 0], sizes = [16, 62], strides = [1, 1]} : vector<16x64xf32> to vector<16x62xf32>
    %38 = tpu.concatenate %36, %37 in 1 : vector<16x2xf32>, vector<16x62xf32> -> vector<16x64xf32>
    %39 = arith.addf %35, %38 : vector<16x64xf32>
    %cst_13 = arith.constant 0.000000e+00 : f32
    %40 = vector.broadcast %cst_13 : f32 to vector<16x4xf32>
    %41 = vector.extract_strided_slice %39 {offsets = [0, 0], sizes = [16, 60], strides = [1, 1]} : vector<16x64xf32> to vector<16x60xf32>
    %42 = tpu.concatenate %40, %41 in 1 : vector<16x4xf32>, vector<16x60xf32> -> vector<16x64xf32>
    %43 = arith.addf %39, %42 : vector<16x64xf32>
    %cst_14 = arith.constant 0.000000e+00 : f32
    %44 = vector.broadcast %cst_14 : f32 to vector<16x8xf32>
    %45 = vector.extract_strided_slice %43 {offsets = [0, 0], sizes = [16, 56], strides = [1, 1]} : vector<16x64xf32> to vector<16x56xf32>
    %46 = tpu.concatenate %44, %45 in 1 : vector<16x8xf32>, vector<16x56xf32> -> vector<16x64xf32>
    %47 = arith.addf %43, %46 : vector<16x64xf32>
    %cst_15 = arith.constant 0.000000e+00 : f32
    %48 = vector.broadcast %cst_15 : f32 to vector<16x16xf32>
    %49 = vector.extract_strided_slice %47 {offsets = [0, 0], sizes = [16, 48], strides = [1, 1]} : vector<16x64xf32> to vector<16x48xf32>
    %50 = tpu.concatenate %48, %49 in 1 : vector<16x16xf32>, vector<16x48xf32> -> vector<16x64xf32>
    %51 = arith.addf %47, %50 : vector<16x64xf32>
    %cst_16 = arith.constant 0.000000e+00 : f32
    %52 = vector.broadcast %cst_16 : f32 to vector<16x32xf32>
    %53 = vector.extract_strided_slice %51 {offsets = [0, 0], sizes = [16, 32], strides = [1, 1]} : vector<16x64xf32> to vector<16x32xf32>
    %54 = tpu.concatenate %52, %53 in 1 : vector<16x32xf32>, vector<16x32xf32> -> vector<16x64xf32>
    %55 = arith.addf %51, %54 : vector<16x64xf32>
    %56 = vector.extract_strided_slice %55 {offsets = [0, 63], sizes = [16, 1], strides = [1, 1]} : vector<16x64xf32> to vector<16x1xf32>
    %cst_17 = arith.constant 1.000000e+00 : f32
    %57 = vector.broadcast %cst_17 : f32 to vector<16x64xf32>
    %58 = arith.cmpf oeq, %55, %57 : vector<16x64xf32>
    %59 = arith.extui %58 : vector<16x64xi1> to vector<16x64xi32>
    %60 = arith.sitofp %59 : vector<16x64xi32> to vector<16x64xf32>
    %61 = arith.mulf %31, %60 : vector<16x64xf32>
    %62 = tpu.iota {dimensions = array<i32: 1>} : vector<16x64xi32>
    %c0_i32 = arith.constant 0 : i32
    %63 = vector.broadcast %c0_i32 : i32 to vector<16x64xi32>
    %64 = arith.cmpi eq, %62, %63 : vector<16x64xi32>
    %65 = arith.extui %64 : vector<16x64xi1> to vector<16x64xi32>
    %66 = arith.sitofp %65 : vector<16x64xi32> to vector<16x64xf32>
    %cst_18 = arith.constant 0.000000e+00 : f32
    %67 = vector.broadcast %cst_18 : f32 to vector<16x1xf32>
    %68 = arith.cmpf ogt, %56, %67 : vector<16x1xf32>
    %69 = vector.shape_cast %68 : vector<16x1xi1> to vector<16x1xi1>
    %70 = vector.broadcast %69 : vector<16x1xi1> to vector<16x64xi1>
    %71 = arith.select %70, %61, %66 : vector<16x64xi1>, vector<16x64xf32>
    %c0_i32_19 = arith.constant 0 : i32
    %c8_i32 = arith.constant 8 : i32
    %72 = arith.addi %c0_i32_19, %c8_i32 : i32
    %c1_i32 = arith.constant 1 : i32
    scf.for %arg8 = %c0_i32_19 to %72 step %c1_i32  : i32 {
      %c1_i32_21 = arith.constant 1 : i32
      %73 = arith.muli %arg8, %c1_i32_21 : i32
      %c0_i32_22 = arith.constant 0 : i32
      %74 = arith.addi %c0_i32_22, %73 : i32
      %75 = arith.sitofp %74 : i32 to f32
      %cst_23 = arith.constant 1.000000e+00 : f32
      %76 = arith.addf %75, %cst_23 : f32
      %77 = vector.broadcast %76 : f32 to vector<16x64xf32>
      %78 = arith.cmpf oeq, %55, %77 : vector<16x64xf32>
      %79 = arith.extui %78 : vector<16x64xi1> to vector<16x64xi32>
      %80 = arith.sitofp %79 : vector<16x64xi32> to vector<16x64xf32>
      %81 = arith.mulf %31, %80 : vector<16x64xf32>
      %82 = vector.broadcast %75 : f32 to vector<16x1xf32>
      %83 = arith.cmpf ogt, %56, %82 : vector<16x1xf32>
      %84 = vector.shape_cast %83 : vector<16x1xi1> to vector<16x1xi1>
      %85 = vector.broadcast %84 : vector<16x1xi1> to vector<16x64xi1>
      %86 = arith.select %85, %81, %71 : vector<16x64xi1>, vector<16x64xf32>
      %cst_24 = arith.constant dense<0.000000e+00> : vector<3x16xf32>
      %87 = tpu.matmul %5, %86, %cst_24 {dimension_numbers = #tpu.dot_dimension_numbers<[1], [1], [0], [0], [0, 0, 1, 0], [], []>} : vector<3x64xf32>, vector<16x64xf32>, vector<3x16xf32> -> vector<3x16xf32>
      %cst_25 = arith.constant dense<0.000000e+00> : vector<4x16xf32>
      %88 = tpu.matmul %7, %86, %cst_25 {dimension_numbers = #tpu.dot_dimension_numbers<[1], [1], [0], [0], [0, 0, 1, 0], [], []>} : vector<4x64xf32>, vector<16x64xf32>, vector<4x16xf32> -> vector<4x16xf32>
      %89 = arith.subf %87, %3 : vector<3x16xf32>
      %90 = vector.shape_cast %89 : vector<3x16xf32> to vector<1x3x16xf32>
      %c0_26 = arith.constant 0 : index
      %91 = arith.index_cast %74 : i32 to index
      %c0_27 = arith.constant 0 : index
      %c0_28 = arith.constant 0 : index
      %92 = vector.load %arg6[%c0_26, %91, %c0_27, %c0_28] : memref<1x8x3x16xf32, #tpu.memory_space<vmem>>, vector<1x1x3x16xf32>
      %93 = vector.shape_cast %92 : vector<1x1x3x16xf32> to vector<1x3x16xf32>
      %94 = vector.shape_cast %90 : vector<1x3x16xf32> to vector<1x1x3x16xf32>
      tpu.vector_store %arg6[%c0_26, %91, %c0_27, %c0_28], %94 {strides = array<i32>} : memref<1x8x3x16xf32, #tpu.memory_space<vmem>>, vector<1x1x3x16xf32>,
      %95 = vector.shape_cast %88 : vector<4x16xf32> to vector<1x4x16xf32>
      %c0_29 = arith.constant 0 : index
      %96 = arith.index_cast %74 : i32 to index
      %c0_30 = arith.constant 0 : index
      %c0_31 = arith.constant 0 : index
      %97 = vector.load %arg7[%c0_29, %96, %c0_30, %c0_31] : memref<1x8x4x16xf32, #tpu.memory_space<vmem>>, vector<1x1x4x16xf32>
      %98 = vector.shape_cast %97 : vector<1x1x4x16xf32> to vector<1x4x16xf32>
      %99 = vector.shape_cast %95 : vector<1x4x16xf32> to vector<1x1x4x16xf32>
      tpu.vector_store %arg7[%c0_29, %96, %c0_30, %c0_31], %99 {strides = array<i32>} : memref<1x8x4x16xf32, #tpu.memory_space<vmem>>, vector<1x1x4x16xf32>,
    }
    %c8_i32_20 = arith.constant 8 : i32
    return
  }
  func.func @transform_0(%arg0: i32, %arg1: i32) -> (i32, i32, i32) {
    %c0_i32 = arith.constant 0 : i32
    %c0_i32_0 = arith.constant 0 : i32
    return %arg0, %arg1, %c0_i32 : i32, i32, i32
  }
  func.func @transform_1(%arg0: i32, %arg1: i32) -> (i32, i32, i32) {
    %c0_i32 = arith.constant 0 : i32
    %c0_i32_0 = arith.constant 0 : i32
    return %arg0, %c0_i32, %arg1 : i32, i32, i32
  }
  func.func @transform_2(%arg0: i32, %arg1: i32) -> (i32, i32, i32) {
    %c0_i32 = arith.constant 0 : i32
    %c0_i32_0 = arith.constant 0 : i32
    %c0_i32_1 = arith.constant 0 : i32
    return %arg0, %c0_i32, %c0_i32_0 : i32, i32, i32
  }
  func.func @transform_3(%arg0: i32, %arg1: i32) -> (i32, i32, i32) {
    %c0_i32 = arith.constant 0 : i32
    %c0_i32_0 = arith.constant 0 : i32
    %c0_i32_1 = arith.constant 0 : i32
    return %arg0, %c0_i32, %c0_i32_0 : i32, i32, i32
  }
  func.func @transform_4(%arg0: i32, %arg1: i32) -> (i32, i32, i32, i32) {
    %c0_i32 = arith.constant 0 : i32
    %c0_i32_0 = arith.constant 0 : i32
    %c0_i32_1 = arith.constant 0 : i32
    return %arg0, %c0_i32, %c0_i32_0, %arg1 : i32, i32, i32, i32
  }
  func.func @transform_5(%arg0: i32, %arg1: i32) -> (i32, i32, i32, i32) {
    %c0_i32 = arith.constant 0 : i32
    %c0_i32_0 = arith.constant 0 : i32
    %c0_i32_1 = arith.constant 0 : i32
    return %arg0, %c0_i32, %c0_i32_0, %arg1 : i32, i32, i32, i32
  }
}

</mosaic_0001>

<bundles_post_ra>
// kernel: tpu_custom_call.1
= control target key start
LH: loop header
LB: loop body
LE: loop exit
PB: predicated region body
PF: predicated region fallthrough
CT: control target
= control target key end

     0   :  { %11 = vsyncpa [#allocation3], 0  ;;  %s1217_s0 = inlined_call_operand.vmem [shape: f32[2,16,3], index: 0, kind: input, shape index: {}]   ;;  %s1218_s1 = inlined_call_operand.vmem [shape: f32[2,3,16], index: 1, kind: input, shape index: {}]   ;;  %s1219_s2 = inlined_call_operand.vmem [shape: f32[2,3,64], index: 2, kind: input, shape index: {}]   ;;  %s1220_s3 = inlined_call_operand.vmem [shape: f32[2,4,64], index: 3, kind: input, shape index: {}]   ;;  %s1221_s4 = inlined_call_operand.vmem [shape: f32[2,8,3,16], index: 4, kind: output, shape index: {0}]   ;;  %s1222_s5 = inlined_call_operand.hbm [shape: f32[2,8,4,16], index: 5, kind: output, shape index: {1}]  }
   0x1   :  { %13 = vsyncpa [#allocation3 + $0x1], 0  ;;  %s1037_s18 = smov 0   ;;  %s1039_s19 = smov 0  }
   0x2   :  { %s1041_s20 = smov 0   ;;  %s1043_s21 = smov 0  }
   0x3   :  { %s1045_s22 = smov 0   ;;  %s1047_s23 = smov 0  }
   0x4 LB: > { %s780_s24 = sadd.s32 4294967295, %s986_s23   ;;  %s781_s25 = sadd.s32 4294967294, %s986_s23   ;;  %s986_s23 = sphi %s1047_s23, %s19_s23   ;;  %s982_s22 = sphi %s1045_s22, %s1232_s22   ;;  %s978_s21 = sphi %s1043_s21, %s1231_s21   ;;  %s974_s20 = sphi %s1041_s20, %s1230_s20   ;;  %s970_s19 = sphi %s1039_s19, %s1229_s19   ;;  %s966_s18 = sphi %s1037_s18, %s1228_s18  }
   0x5   : > { %s31_s26 = sadd.s32 1, %s982_s22  ;;  %s176_s27 = sadd.s32 1, %s974_s20 }
   0x6   : > { %p33_p0 = scmp.ge.s32.totalorder %s31_s26, 2  ;;  %p186_p1 = scmp.ne.s32.totalorder %s974_s20, %s970_s19 }
   0x7   : > { %p187_p2 = scmp.eq.s32.totalorder %s780_s24, 1  ;;  %p192_p3 = scmp.ne.s32.totalorder %s970_s19, %s966_s18 }
   0x8   : > { %s1234_s26 = smov (%p33_p0, %s31_s26), 0  ;;  %p193_p5 = scmp.eq.s32.totalorder %s781_s25, 1 }
   0x9   : > { %1224 = sst [smem:[#allocation5_spill]] %s1234_s26  ;;  %p1077_p4 = por %p187_p2, %p186_p1 }
   0xa   : > { %s171_s29 = ssub.s32 %s982_s22, %s1234_s26  ;;  %p784_p6 = scmp.ge.s32.totalorder %s986_s23, 1 }
   0xb   : > { %p174_p7 = scmp.eq.s32.totalorder %s171_s29, 0  ;;  %p1084_p8 = por %p193_p5, %p192_p3 }
   0xc   : > { %p248_p9 = scmp.lt.s32.totalorder %s986_s23, 3 }
   0xd   : > { %s1090_s6 = scalar_select %p174_p7, %s974_s20, %s176_s27  }
   0xe   : > { %p249_p10 = pnand %p784_p6, %p248_p9 }
   0xf   : > { %p304_p11 = scmp.lt.s32.totalorder (!%p249_p10), %s978_s21, 1  ;;  %s997_s10 = smov (!%p249_p10), 2  }
  0x10   : > { %252 = sbr.rel (%p249_p10) target bundleno = 1211 (0x4bb), region = 36  ;;  %s998_s11 = smov (!%p249_p10), 4  }
  0x11   : > { %s1000_s13 = smov (!%p249_p10), 16   ;;  %s1001_s14 = smov (!%p249_p10), 32  }
  0x15   : > { %v992_v0 = vmov 1   ;;  %v993_v1 = vmov 0   ;;  %s305_s7 = scalar_select %p304_p11, %s978_s21, 1  ;;  %v994_v2 = vmov 2   ;;  %v995_v33 = vmov 0.0  }
  0x16   : > { %894 = vset.pattern.permute.xlu1 %v992_v0  ;;  %893 = vset.pattern.permute.xlu0 %v993_v1  ;;  %vm400_vm2 = vcmask 7168   ;;  %vm413_vm3 = vcmask 15360   ;;  %vm426_vm4 = vcmask 31744   ;;  %vm439_vm5 = vcmask 64512  }
  0x17   : > { %895 = vset.pattern.permute.xlu2 %v994_v2  ;;  %s812_s8 = sshll.u32 %s305_s7, 4  ;;  %s813_s9 = sshll.u32 %s305_s7, 5  ;;  %vm452_vm6 = vcmask 130048   ;;  %vm465_vm7 = vcmask 261120  }
  0x18   : > { %s311_s12 = scalar_lea.vmem %s1217_s0, %s812_s8  ;;  %s1101_s15 = scalar_lea.vmem %s1221_s4, %s813_s9 }
  0x19   : > { %v336_v3 = vld [vmem:[%s311_s12] sm:$0xff]  ;;  %s788_s16 = sshll.u32 %s305_s7, 2  ;;  %v337_v6 = vld [vmem:[%s311_s12 + $0x8] sm:$0xff]  ;;  %s999_s12 = smov 8  }
  0x1a   : > { %357 = vperm.xlu1 %894, %v336_v3   ;;  %343 = vperm.xlu0 %893, %v336_v3   ;;  %s319_s25 = scalar_lea.vmem %s1218_s1, %s788_s16  ;;  %s327_s26 = scalar_lea.vmem %s1220_s3, %s788_s16 }
  0x1b   : > { %372 = vperm.xlu2 %895, %v336_v3   ;;  %v1109_v4 = vld [vmem:[%s319_s25] sm:$0x7]  ;;  %s323_s9 = scalar_lea.vmem %s1219_s2, %s788_s16  ;;  %s300_s16 = sand.u32 1, %s970_s19  }
  0x1c   : > { %v1111_v5 = vld [vmem:[%s327_s26] sm:$0xf]  ;;  %s996_s26 = smov 1   ;;  %s1136_s17 = sshll.u32 %s300_s16, 5 }
  0x1d   : > { %v1116_v7 = vld [vmem:[%s323_s9] sm:$0x7]  ;;  %s302_s24 = scalar_lea.vmem [#allocation2], %s1136_s17  ;;  %s1154_s25 = smov 0  }
  0x1e   : > { %v364_v9 = vperm.slane %v1116_v7, 1  ;;  %v351_v10 = vperm.slane %v1116_v7, 0  ;;  %v379_v11 = vperm.slane %v1116_v7, 2 }
  0x22   : > { %361 = vperm.xlu1 %894, %v337_v6   ;;  %348 = vperm.xlu0 %893, %v337_v6  }
  0x23   : > { %376 = vperm.xlu2 %895, %v337_v6  }
  0x75   : > { %v373_v8 = vpop.permute.xlu2 %372 }
  0x76   : > { %v380_v16 = vsub.f32 %v373_v8, %v379_v11  ;;  %v1002_v8 = vmov 63  }
  0x77   : > { %902 = vset.pattern.permute.xlu0 %v1002_v8  ;;  %901 = vset.pattern.permute.xlu2 %v1002_v8 }
  0x78   : > { %v382_v20 = vmul.f32 %v380_v16, %v380_v16 }
  0x7d   : > { %v377_v19 = vpop.permute.xlu2 %376 }
  0x7e   : > { %v381_v24 = vsub.f32 %v377_v19, %v379_v11 }
  0x80   : > { %v383_v30 = vmul.f32 %v381_v24, %v381_v24 }
  0x8c   : > { %v358_v12 = vpop.permute.xlu1 %357  ;;  %v344_v13 = vpop.permute.xlu0 %343 }
  0x8d   : > { %v365_v14 = vsub.f32 %v358_v12, %v364_v9  ;;  %v352_v15 = vsub.f32 %v344_v13, %v351_v10 }
  0x8f   : > { %v367_v17 = vmul.f32 %v365_v14, %v365_v14  ;;  %v354_v18 = vmul.f32 %v352_v15, %v352_v15 }
  0x91   : > { %v369_v21 = vadd.f32 %v367_v17, %v354_v18  ;;  %v478_v17 = vlaneseq }
  0x93   : > { %v384_v27 = vadd.f32 %v382_v20, %v369_v21  ;;  %v479_v18 = vand.u32 127, %v478_v17 }
  0x94   : > { %v362_v22 = vpop.permute.xlu1 %361  ;;  %v349_v23 = vpop.permute.xlu0 %348 }
  0x95   : > { %v366_v25 = vsub.f32 %v362_v22, %v364_v9  ;;  %v353_v26 = vsub.f32 %v349_v23, %v351_v10  ;;  %vm386_vm0 = vcmp.lt.f32.partialorder %v384_v27, 0.0625  ;;  %vm480_vm12 = vcmp.eq.s32.totalorder %v479_v18, 0 }
  0x96   : > { %v1122_v34 = vsel %vm386_vm0, 1.0, %v995_v33  ;;  %v797_v21 = vsel %vm480_vm12, 1.0, %v995_v33 }
  0x97   : > { %v368_v28 = vmul.f32 %v366_v25, %v366_v25  ;;  %v355_v29 = vmul.f32 %v353_v26, %v353_v26 }
  0x99   : > { %v370_v31 = vadd.f32 %v368_v28, %v355_v29 }
  0x9b   : > { %v385_v32 = vadd.f32 %v383_v30, %v370_v31 }
  0x9d   : > { %vm387_vm1 = vcmp.lt.f32.partialorder %v385_v32, 0.0625 }
  0x9e   : > { %v1125_v35 = vsel %vm387_vm1, 1.0, %v995_v33 }
  0x9f   : > { %v896_v36 = vpack.i.bf16 %v1125_v35, %v1122_v34 }
  0xa1   : > { %897 = vrot.lane.b32.xlu0 %v896_v36, %s996_s26 }
 0x113   : > { %v898_v37 = vpop.permute.xlu0 %897 }
 0x114   : > { %v900_v38 = vunpack.i.h.bf16 %v898_v37  ;;  %v899_v39 = vunpack.i.l.bf16 %v898_v37 }
 0x116   : > { %v402_v40 = vsel %vm400_vm2, 0.0, %v900_v38  ;;  %v401_v41 = vsel %vm400_vm2, 0.0, %v899_v39 }
 0x117   : > { %v404_v42 = vadd.f32 %v1125_v35, %v402_v40  ;;  %v403_v43 = vadd.f32 %v1122_v34, %v401_v41 }
 0x119   : > { %409 = vrot.lane.b32.xlu2 %v404_v42, %s997_s10  ;;  %407 = vrot.lane.b32.xlu1 %v403_v43, %s997_s10 }
 0x173   : > { %v410_v44 = vpop.permute.xlu2 %409 }
 0x174   : > { %v415_v45 = vsel %vm413_vm3, 0.0, %v410_v44 }
 0x175   : > { %v417_v46 = vadd.f32 %v415_v45, %v404_v42 }
 0x177   : > { %422 = vrot.lane.b32.xlu1 %v417_v46, %s998_s11 }
 0x18b   : > { %v408_v47 = vpop.permute.xlu1 %407 }
 0x18c   : > { %v414_v48 = vsel %vm413_vm3, 0.0, %v408_v47 }
 0x18d   : > { %v416_v49 = vadd.f32 %v414_v48, %v403_v43 }
 0x18f   : > { %420 = vrot.lane.b32.xlu0 %v416_v49, %s998_s11 }
 0x1e9   : > { %v423_v50 = vpop.permute.xlu1 %422 }
 0x1ea   : > { %v428_v51 = vsel %vm426_vm4, 0.0, %v423_v50 }
 0x1eb   : > { %v430_v52 = vadd.f32 %v428_v51, %v417_v46 }
 0x1ed   : > { %435 = vrot.lane.b32.xlu0 %v430_v52, %s999_s12 }
 0x201   : > { %v421_v53 = vpop.permute.xlu0 %420 }
 0x202   : > { %v427_v54 = vsel %vm426_vm4, 0.0, %v421_v53 }
 0x203   : > { %v429_v55 = vadd.f32 %v427_v54, %v416_v49 }
 0x205   : > { %433 = vrot.lane.b32.xlu2 %v429_v55, %s999_s12 }
 0x25f   : > { %v434_v56 = vpop.permute.xlu2 %433  ;;  %v436_v57 = vpop.permute.xlu0 %435 }
 0x260   : > { %v440_v58 = vsel %vm439_vm5, 0.0, %v434_v56  ;;  %v441_v59 = vsel %vm439_vm5, 0.0, %v436_v57 }
 0x261   : > { %v442_v60 = vadd.f32 %v440_v58, %v429_v55  ;;  %v443_v61 = vadd.f32 %v441_v59, %v430_v52 }
 0x263   : > { %446 = vrot.lane.b32.xlu1 %v442_v60, %s1000_s13  ;;  %448 = vrot.lane.b32.xlu2 %v443_v61, %s1000_s13 }
 0x2bd   : > { %v449_v62 = vpop.permute.xlu2 %448 }
 0x2be   : > { %v454_v63 = vsel %vm452_vm6, 0.0, %v449_v62 }
 0x2bf   : > { %v456_v0 = vadd.f32 %v454_v63, %v443_v61 }
 0x2c1   : > { %461 = vrot.lane.b32.xlu1 %v456_v0, %s1001_s14 }
 0x2d5   : > { %v447_v2 = vpop.permute.xlu1 %446 }
 0x2d6   : > { %v453_v3 = vsel %vm452_vm6, 0.0, %v447_v2 }
 0x2d7   : > { %v455_v6 = vadd.f32 %v453_v3, %v442_v60 }
 0x2d9   : > { %459 = vrot.lane.b32.xlu0 %v455_v6, %s1001_s14 }
 0x333   : > { %v462_v9 = vpop.permute.xlu1 %461 }
 0x334   : > { %v467_v10 = vsel %vm465_vm7, 0.0, %v462_v9 }
 0x335   : > { %v1138_v11 = vadd.f32 %v467_v10, %v456_v0 }
 0x337   : > { %vm484_vm8 = vcmp.gt.f32.partialorder %v1138_v11, 0.0  ;;  %vm471_vm10 = vcmp.eq.f32.partialorder %v1138_v11, 1.0 }
 0x338   : > { %v486_v12 = vsel %vm484_vm8, 1, %v993_v1  ;;  %v796_v19 = vsel %vm471_vm10, 1.0, %v995_v33 }
 0x339   : > { %491 = vperm.xlu0 %902, %v486_v12   ;;  %v477_v22 = vmul.f32 %v796_v19, %v1125_v35 }
 0x34b   : > { %v460_v13 = vpop.permute.xlu0 %459 }
 0x34c   : > { %v466_v14 = vsel %vm465_vm7, 0.0, %v460_v13 }
 0x34d   : > { %v1142_v15 = vadd.f32 %v466_v14, %v455_v6 }
 0x34f   : > { %vm483_vm9 = vcmp.gt.f32.partialorder %v1142_v15, 0.0  ;;  %vm470_vm11 = vcmp.eq.f32.partialorder %v1142_v15, 1.0 }
 0x350   : > { %v485_v16 = vsel %vm483_vm9, 1, %v993_v1  ;;  %v795_v20 = vsel %vm470_vm11, 1.0, %v995_v33 }
 0x351   : > { %488 = vperm.xlu2 %901, %v485_v16   ;;  %v476_v23 = vmul.f32 %v795_v20, %v1122_v34 }
 0x3ab   : > { %v489_v1 = vpop.permute.xlu2 %488  ;;  %v492_v24 = vpop.permute.xlu0 %491 }
 0x3ac   : > { %vm493_vm13 = vcmp.eq.s32.totalorder %v489_v1, 1  ;;  %vm494_vm14 = vcmp.eq.s32.totalorder %v492_v24, 1 }
 0x3ad   : > { %v495_v25 = vsel %vm493_vm13, %v476_v23, %v797_v21  ;;  %v496_v26 = vsel %vm494_vm14, %v477_v22, %v797_v21 }
 0x3ae LB: >> { %v1003_v27 = vmov 63   ;;  %s503_s27 = scvt.s32.f32 %s990_s25  ;;  %v1004_v29 = vmov 0   ;;  %v1005_v33 = vmov 0.0   ;;  %vm529_vm2 = vcmask 523264   ;;  %s806_s7 = sshll.u32 %s990_s25, 2  ;;  %s990_s25 = sphi %s1154_s25, %s502_s25  }
 0x3af   : >> { %903 = vset.pattern.permute.xlu0 %v1003_v27  ;;  %s587_s8 = scalar_lea.vmem %s302_s24, %s806_s7 [#allocation2]  ;;  %vm588_vm6 = vcmask 125952   ;;  %s584_s9 = scalar_lea.vmem %s1101_s15, %s806_s7  ;;  %vm585_vm7 = vcmask 124928  }
 0x3b0   : >> { %v514_v28 = vstv %s503_s27  ;;  %s504_s29 = sadd.f32 1.0, %s503_s27  ;;  %s502_s25 = sadd.s32 1, %s990_s25  }
 0x3b1   : >> { %vm516_vm15 = vcmp.gt.f32.partialorder %v1138_v11, %v514_v28  ;;  %vm515_vm0 = vcmp.gt.f32.partialorder %v1142_v15, %v514_v28  ;;  %p499_p12 = scmp.ge.s32.totalorder %s502_s25, 8  }
 0x3b2   : >> { %v518_v30 = vsel %vm516_vm15, 1, %v1004_v29  ;;  %v517_v31 = vsel %vm515_vm0, 1, %v1004_v29  ;;  %v505_v32 = vstv %s504_s29  ;;  %s814_s26 = sshll.u32 (%p499_p12), %s978_s21, 5  ;;  %s615_s14 = sshll.u32 (%p499_p12), %s302_s24, 4  ;;  %s616_s14 = int_to_ptr.vmem [resolvable:$true] %s615_s14 }
 0x3b3   : >> { %523 = vperm.xlu0 %903, %v518_v30   ;;  %vm507_vm1 = vcmp.eq.f32.partialorder %v1138_v11, %v505_v32  ;;  %vm506_vm3 = vcmp.eq.f32.partialorder %v1142_v15, %v505_v32  ;;  %s614_s13 = scalar_lea.hbm (%p499_p12), %s1222_s5, %s814_s26  ;;  %s599_s29 = scalar_lea.sflag (%p499_p12), [#allocation3], %s300_s16 }
 0x3b4   : >> { %v799_v36 = vsel %vm507_vm1, 1.0, %v1005_v33  ;;  %v798_v40 = vsel %vm506_vm3, 1.0, %v1005_v33  ;;  %s617_s27 = sshll.u32 (%p499_p12), %s614_s13, 4  ;;  %s618_s27 = int_to_ptr.hbm [resolvable:$true] %s617_s27 }
 0x3b5   : >> { %v513_v37 = vmul.f32 %v799_v36, %v1125_v35  ;;  %v512_v41 = vmul.f32 %v798_v40, %v1122_v34  ;;  %s918_s7 = sshra.s32 (%p499_p12), %s618_s27, 4  ;;  %s919_s7 = int_to_ptr.hbm [resolvable:$true] %s918_s7 }
 0x3b6   : > { %s920_s25 = scalar_lea.hbm (%p499_p12), %s919_s7, 32  ;;  %p925_p2 = scmp.lt.s32.totalorder (%p499_p12), %s919_s7, %s1222_s5 }
 0x3b7   : > { %p921_p13 = scmp.ne.s32.totalorder (%p499_p12), %s919_s7, %s920_s25 }
 0x3b9   : > { %p922_p0 = pnand (%p499_p12), %p921_p13, %p1077_p4 }
 0x3bb   : >> { %520 = vperm.xlu0 %903, %v517_v31   ;;  %p923_p1 = pneg (%p499_p12), %p922_p0 }
 0x425   : >> { %v524_v38 = vpop.permute.xlu0 %523 }
 0x426   : >> { %vm526_vm4 = vcmp.eq.s32.totalorder %v524_v38, 1 }
 0x427   : >> { %v528_v39 = vsel %vm526_vm4, %v513_v37, %v496_v26 }
 0x428   : >> { %800 = vmatpush.xpose.msk.msra.mxu0 %vm529_vm2, %v528_v39  ;;  %803 = vmatpush.xpose.msk.msra.mxu1 %vm529_vm2, %v528_v39 }
 0x42d   : >> { %v521_v42 = vpop.permute.xlu0 %520 }
 0x42e   : >> { %vm525_vm5 = vcmp.eq.s32.totalorder %v521_v42, 1 }
 0x42f   : >> { %v527_v43 = vsel %vm525_vm5, %v512_v41, %v495_v25 }
 0x430   : >> { %801 = vmatpush.xpose.msk.msra.mxu0 %vm529_vm2, %v527_v43  ;;  %804 = vmatpush.xpose.msk.msra.mxu1 %vm529_vm2, %v527_v43 }
 0x433   : >> { %802 = vmatmul.msk.f32.vlgmr.msra.gmra.mxu0 %vm529_vm2, %v1116_v7  ;;  %805 = vmatmul.msk.f32.vlgmr.msra.gmra.mxu1 %vm529_vm2, %v1111_v5 }
 0x4af   : > { %501 = sbr.rel (!%p499_p12) target bundleno = 942 (0x3ae), region = 101 }
 0x4b0   : >> { %v556_v44 = vpop.f32.mrf.mxu0  ;;  %v579_v45 = vpop.f32.mrf.mxu1 }
 0x4b1   : >> { %v582_v46 = vsub.f32 %v556_v44, %v1109_v4  ;;  %589 = vst.msk [vmem:[%s587_s8] sm:$0xf] %vm588_vm6, %v579_v45  ;;  %s924_s8 = scalar_lea.hbm (%p499_p12), %s1222_s5, 64 }
 0x4b2   : > { %p926_p3 = scmp.lt.s32.totalorder (%p499_p12), %s924_s8, %s920_s25 }
 0x4b3   : >> { %586 = vst.msk [vmem:[%s584_s9] sm:$0x7] %vm585_vm7, %v582_v46 }
 0x4b4   : > { %p927_p5 = por %p926_p3, %p925_p2 }
 0x4b6   : > { %p928_p6 = pnand %p927_p5, %p923_p1 }
 0x4b8   : > { %931 = shalt.err (!%p928_p6)
}
 0x4b9   : > { %s1006_s16 = smov 64  }
 0x4ba   : > { %815 = dma.vmem_to_hbm [thread:$0]  (%p1077_p4), %s616_s14, 512, %s618_s27, %s599_s29, %s1006_s16, %s1006_s16, %s998_s11  }
 0x4bb PF: > { %p821_p7 = scmp.ge.s32.totalorder %s986_s23, 2  ;;  %s643_s17 = sand.u32 1, %s966_s18  }
 0x4bc   : > { %s644_s24 = scalar_lea.sflag [#allocation3], %s643_s17 }
 0x4bd   : > { %p818_p9 = pnand %p821_p7, %p1084_p8 }
 0x4bf   : > { %p819_p10 = pneg %p818_p9 }
 0x4c1   : > { %961 = dma.done.wait (%p819_p10), %s644_s24, 512  }
 0x4c2   : > { %963 = vsyncadd (%p819_p10), %s644_s24, 4294966784  ;;  %s19_s23 = sadd.s32 1, %s986_s23   ;;  %s1227_s28 = sld [smem:[#allocation5_spill]] }
 0x4c3   : > { %p16_p11 = scmp.ge.s32.totalorder %s19_s23, 4   ;;  %s1228_s18 = smov %s970_s19 }
 0x4c4   : > { %s1229_s19 = smov %s974_s20  ;;  %s1230_s20 = smov %s1090_s6 }
 0x4c5   : > { %s1231_s21 = smov %s982_s22  ;;  %18 = sbr.rel (!%p16_p11) target bundleno = 4 (0x4), region = 112 }
 0x4c8   : > { %s1232_s22 = smov %s1227_s28 }
 0x4ca   :  { %650 = vsyncpa [#allocation3], 1 }
 0x4cb   :  { %652 = vsyncpa [#allocation3 + $0x1], 1 }

</bundles_post_ra>
